<compile_context>
chip_gen: v7x
topology: tpu7x:2x2x1
jax: 0.10.0
libtpu: 0.0.40
codegen_flags: <defaults>
</compile_context>

<pallas_src>
import math
import functools

import jax
import jax.numpy as jnp
from jax import lax
from jax.experimental import pallas as pl
from jax.experimental.pallas import tpu as pltpu

_EPS = 1e-12  # F.normalize default eps


def _round_up(x, m):
    return (x + m - 1) // m * m


def _arcface_kernel(x_ref, inv_xn_ref, w_ref, inv_wn_ref, labels_ref, scale_ref,
                    out_ref, *, arcface_margin, apply_margin, matmul_dtype):
    # Normalized operands: inverse norms are precomputed outside the kernel,
    # so this is just two broadcast multiplies on the VPU.
    xn = x_ref[...].astype(jnp.float32) * inv_xn_ref[...]        # [TB, E]
    wn = w_ref[...].astype(jnp.float32) * inv_wn_ref[...]        # [E, TC]

    # Cosine similarity on the MXU (bf16 inputs by default, f32 accumulation).
    cosine = jnp.dot(xn.astype(matmul_dtype), wn.astype(matmul_dtype),
                     preferred_element_type=jnp.float32)         # [TB, TC]

    if apply_margin:
        tb, tc = cosine.shape
        labels = labels_ref[...]                                  # [TB, 1] i32
        col0 = pl.program_id(1) * tc                              # C-tile offset
        class_ids = col0 + lax.broadcasted_iota(jnp.int32, (tb, tc), 1)
        one_hot = labels == class_ids                             # [TB, TC] bool

        cos_m = math.cos(arcface_margin)
        sin_m = math.sin(arcface_margin)

        # Narrow epilogue: pull the single target-class cosine per row,
        # apply the margin identity on [TB, 1], scatter back with one where.
        target_cos = jnp.sum(jnp.where(one_hot, cosine, 0.0),
                             axis=1, keepdims=True)               # [TB, 1]
        tgt = jnp.clip(target_cos, -1.0, 1.0)
        sin_theta = jnp.sqrt(jnp.maximum(1.0 - tgt * tgt, 0.0))
        adjusted = tgt * cos_m - sin_theta * sin_m                # cos(theta+m)
        # theta > pi - m  <=>  cos(theta) < -cos(m): drop the margin there.
        adjusted = jnp.where(tgt >= -cos_m, adjusted, target_cos)
        cosine = jnp.where(one_hot, adjusted, cosine)

    scale = scale_ref[0]                                          # SMEM scalar
    out_ref[...] = (scale * cosine).astype(out_ref.dtype)


def arcface_forward(global_features, cosine_weights, scale_factor, labels=None,
                    *, arcface_margin=0.1, training=True,
                    matmul_dtype=jnp.bfloat16, tile_b=None, tile_c=None):
    """ArcFace forward.

    global_features: [B, E] float32
    cosine_weights : [E, C] float32
    scale_factor   : [1]    float32
    labels         : [B]    int32 (required when training and margin > 0)
    returns logits : [B, C] float32
    """
    b, e = global_features.shape
    e2, c = cosine_weights.shape
    assert e == e2

    apply_margin = bool(training and arcface_margin > 0)
    if apply_margin:
        assert labels is not None

    # Tile sizes: TC multiple of 128 (lane-dense output stores), TB multiple
    # of 8 (f32) / 16 (bf16 sublane packing).
    sub = 16 if matmul_dtype == jnp.bfloat16 else 8
    if tile_c is None:
        tile_c = min(512, _round_up(c, 128))
    if tile_b is None:
        tile_b = min(256, _round_up(b, sub))
    tile_c = _round_up(tile_c, 128)
    tile_b = _round_up(tile_b, 8)

    pb = _round_up(b, tile_b)
    pc = _round_up(c, tile_c)

    # Pad to tile multiples (zero rows/cols; sliced away after the call).
    x = global_features.astype(jnp.float32)
    w = cosine_weights.astype(jnp.float32)
    if pb != b:
        x = jnp.pad(x, ((0, pb - b), (0, 0)))
    if pc != c:
        w = jnp.pad(w, ((0, 0), (0, pc - c)))

    # Hoisted normalizations: tiny XLA reductions, each operand read once.
    inv_x_norm = 1.0 / jnp.maximum(
        jnp.sqrt(jnp.sum(x * x, axis=1, keepdims=True)), _EPS)    # [pb, 1]
    inv_w_norm = 1.0 / jnp.maximum(
        jnp.sqrt(jnp.sum(w * w, axis=0, keepdims=True)), _EPS)    # [1, pc]

    if apply_margin:
        lbl = labels.astype(jnp.int32).reshape(b, 1)
        if pb != b:
            lbl = jnp.pad(lbl, ((0, pb - b), (0, 0)))
    else:
        lbl = jnp.zeros((pb, 1), dtype=jnp.int32)  # unused placeholder

    grid = (pb // tile_b, pc // tile_c)

    kernel = functools.partial(
        _arcface_kernel,
        arcface_margin=float(arcface_margin),
        apply_margin=apply_margin,
        matmul_dtype=matmul_dtype,
    )

    # Rough double-buffered VMEM budget -> explicit scoped limit (fits every
    # generation: >= 16 MiB, <= v7x's 64 MiB physical VMEM).
    est = 2 * 4 * (tile_b * e + e * tile_c + tile_b * tile_c
                   + 2 * tile_b + tile_c)
    vmem_limit = int(min(max(3 * est, 16 * 1024 * 1024), 64 * 1024 * 1024))

    out = pl.pallas_call(
        kernel,
        out_shape=jax.ShapeDtypeStruct((pb, pc), jnp.float32),
        grid=grid,
        in_specs=[
            pl.BlockSpec((tile_b, e), lambda i, j: (i, 0)),       # features
            pl.BlockSpec((tile_b, 1), lambda i, j: (i, 0)),       # 1/||x_row||
            pl.BlockSpec((e, tile_c), lambda i, j: (0, j)),       # weights
            pl.BlockSpec((1, tile_c), lambda i, j: (0, j)),       # 1/||w_col||
            pl.BlockSpec((tile_b, 1), lambda i, j: (i, 0)),       # labels
            pl.BlockSpec(memory_space=pltpu.MemorySpace.SMEM),    # scale (1,)
        ],
        out_specs=pl.BlockSpec((tile_b, tile_c), lambda i, j: (i, j)),
        compiler_params=pltpu.CompilerParams(
            dimension_semantics=("parallel", "parallel"),
            vmem_limit_bytes=vmem_limit,
        ),
    )(x, inv_x_norm, w, inv_w_norm, lbl, scale_factor.astype(jnp.float32))

    return out[:b, :c]


if __name__ == "__main__":
    # Small, module-consistent shapes; C not a multiple of 128 and B not a
    # multiple of 8 to exercise the padding + multi-tile grid paths.
    batch_size = 10
    embedding_size = 32
    num_classes = 300
    scale_init = 45.25
    margin = 0.1

    key = jax.random.PRNGKey(0)
    k_feat, k_w, k_lbl = jax.random.split(key, 3)

    # Deterministic parameter init mirroring reset_parameters():
    # cosine_weights ~ U(-stdv, stdv), stdv = 1/sqrt(num_classes)
    stdv = 1.0 / math.sqrt(num_classes)
    cosine_weights = jax.random.uniform(
        k_w, (embedding_size, num_classes), dtype=jnp.float32,
        minval=-stdv, maxval=stdv)
    scale_factor = jnp.ones((1,), dtype=jnp.float32) * scale_init
    global_features = jax.random.normal(
        k_feat, (batch_size, embedding_size), dtype=jnp.float32)
    labels = jax.random.randint(
        k_lbl, (batch_size,), 0, num_classes, dtype=jnp.int32)

    def reference(matmul_dtype, training):
        xn = global_features / jnp.maximum(
            jnp.linalg.norm(global_features, axis=1, keepdims=True), _EPS)
        wn = cosine_weights / jnp.maximum(
            jnp.linalg.norm(cosine_weights, axis=0, keepdims=True), _EPS)
        cos = jnp.dot(xn.astype(matmul_dtype), wn.astype(matmul_dtype),
                      preferred_element_type=jnp.float32)
        if training and margin > 0:
            theta = jnp.arccos(jnp.clip(cos, -1.0, 1.0))
            one_hot = jax.nn.one_hot(labels, num_classes, dtype=jnp.int32)
            selected = jnp.where(theta > math.pi - margin,
                                 jnp.zeros_like(one_hot), one_hot)
            final_theta = jnp.where(selected.astype(bool), theta + margin, theta)
            cos = jnp.cos(final_theta)
        return scale_factor * cos

    # 1) f32 MXU path, training (margin applied): tight semantic check.
    #    tile_b=8 / tile_c=128 -> 2x3 grid exercises both grid axes + padding.
    out_f32 = arcface_forward(
        global_features, cosine_weights, scale_factor, labels,
        arcface_margin=margin, training=True,
        matmul_dtype=jnp.float32, tile_b=8, tile_c=128)
    jax.block_until_ready(out_f32)
    ref_f32 = reference(jnp.float32, True)
    assert out_f32.shape == (batch_size, num_classes)
    assert jnp.allclose(out_f32, ref_f32, atol=2e-3, rtol=2e-3), (
        float(jnp.max(jnp.abs(out_f32 - ref_f32))))

    # 2) bf16 MXU path (default perf path on v6e/v7x), training: check against
    #    a reference with the same matmul precision.
    out_bf16 = arcface_forward(
        global_features, cosine_weights, scale_factor, labels,
        arcface_margin=margin, training=True,
        matmul_dtype=jnp.bfloat16, tile_c=128)
    jax.block_until_ready(out_bf16)
    ref_bf16 = reference(jnp.bfloat16, True)
    assert jnp.allclose(out_bf16, ref_bf16, atol=5e-2, rtol=5e-2), (
        float(jnp.max(jnp.abs(out_bf16 - ref_bf16))))

    # 3) inference path (no margin).
    out_eval = arcface_forward(
        global_features, cosine_weights, scale_factor, labels=None,
        arcface_margin=margin, training=False,
        matmul_dtype=jnp.float32, tile_c=128)
    jax.block_until_ready(out_eval)
    ref_eval = reference(jnp.float32, False)
    assert jnp.allclose(out_eval, ref_eval, atol=2e-3, rtol=2e-3)

    print("KERNEL_OK")
</pallas_src>

<mosaic_0001>
module attributes {stable_mosaic.version = 11 : i64} {
  func.func @_arcface_kernel(%arg0: i32, %arg1: i32, %arg2: memref<8x32xf32, #tpu.memory_space<vmem>>, %arg3: memref<8x1xf32, #tpu.memory_space<vmem>>, %arg4: memref<32x128xf32, #tpu.memory_space<vmem>>, %arg5: memref<1x128xf32, #tpu.memory_space<vmem>>, %arg6: memref<8x1xi32, #tpu.memory_space<vmem>>, %arg7: memref<1xf32, #tpu.memory_space<smem>>, %arg8: memref<8x128xf32, #tpu.memory_space<vmem>>) attributes {dimension_semantics = [#tpu.dimension_semantics<parallel>, #tpu.dimension_semantics<parallel>], iteration_bounds = array<i64: 2, 3>, scalar_prefetch = 0 : i64, scratch_operands = 0 : i64, tpu.core_type = #tpu.core_type<tc>, window_params = [{transform_indices = @transform_0, window_bounds = array<i64: 8, 32>}, {transform_indices = @transform_1, window_bounds = array<i64: 8, 1>}, {transform_indices = @transform_2, window_bounds = array<i64: 32, 128>}, {transform_indices = @transform_3, window_bounds = array<i64: 1, 128>}, {transform_indices = @transform_4, window_bounds = array<i64: 8, 1>}, {transform_indices = @transform_5, window_bounds = array<i64: 1>}, {transform_indices = @transform_6, window_bounds = array<i64: 8, 128>}]} {
    %c0 = arith.constant 0 : index
    %c0_0 = arith.constant 0 : index
    %0 = vector.load %arg2[%c0, %c0_0] : memref<8x32xf32, #tpu.memory_space<vmem>>, vector<8x32xf32>
    %c0_1 = arith.constant 0 : index
    %c0_2 = arith.constant 0 : index
    %1 = vector.load %arg3[%c0_1, %c0_2] : memref<8x1xf32, #tpu.memory_space<vmem>>, vector<8x1xf32>
    %2 = vector.broadcast %1 : vector<8x1xf32> to vector<8x32xf32>
    %3 = arith.mulf %0, %2 : vector<8x32xf32>
    %c0_3 = arith.constant 0 : index
    %c0_4 = arith.constant 0 : index
    %4 = vector.load %arg4[%c0_3, %c0_4] : memref<32x128xf32, #tpu.memory_space<vmem>>, vector<32x128xf32>
    %c0_5 = arith.constant 0 : index
    %c0_6 = arith.constant 0 : index
    %5 = vector.load %arg5[%c0_5, %c0_6] : memref<1x128xf32, #tpu.memory_space<vmem>>, vector<1x128xf32>
    %6 = vector.broadcast %5 : vector<1x128xf32> to vector<32x128xf32>
    %7 = arith.mulf %4, %6 : vector<32x128xf32>
    %cst = arith.constant dense<0.000000e+00> : vector<8x128xf32>
    %8 = tpu.matmul %3, %7, %cst {dimension_numbers = #tpu.dot_dimension_numbers<[1], [0], [0], [1], [0, 0, 1, 1], [], []>} : vector<8x32xf32>, vector<32x128xf32>, vector<8x128xf32> -> vector<8x128xf32>
    %c0_7 = arith.constant 0 : index
    %c0_8 = arith.constant 0 : index
    %9 = vector.load %arg6[%c0_7, %c0_8] : memref<8x1xi32, #tpu.memory_space<vmem>>, vector<8x1xi32>
    %c128_i32 = arith.constant 128 : i32
    %10 = arith.muli %arg1, %c128_i32 : i32
    %11 = tpu.iota {dimensions = array<i32: 1>} : vector<8x128xi32>
    %12 = vector.broadcast %10 : i32 to vector<8x128xi32>
    %13 = arith.addi %12, %11 : vector<8x128xi32>
    %14 = vector.broadcast %9 : vector<8x1xi32> to vector<8x128xi32>
    %15 = arith.cmpi eq, %14, %13 : vector<8x128xi32>
    %cst_9 = arith.constant 0.000000e+00 : f32
    %16 = vector.broadcast %cst_9 : f32 to vector<8x128xf32>
    %17 = arith.select %15, %8, %16 : vector<8x128xi1>, vector<8x128xf32>
    %cst_10 = arith.constant dense<0.000000e+00> : vector<8xf32>
    %18 = vector.multi_reduction <add>, %17, %cst_10 [1] : vector<8x128xf32> to vector<8xf32>
    %19 = vector.shape_cast %18 : vector<8xf32> to vector<8x1xf32>
    %cst_11 = arith.constant -1.000000e+00 : f32
    %cst_12 = arith.constant 1.000000e+00 : f32
    %20 = vector.broadcast %cst_11 : f32 to vector<8x1xf32>
    %21 = arith.maximumf %20, %19 : vector<8x1xf32>
    %22 = vector.broadcast %cst_12 : f32 to vector<8x1xf32>
    %23 = arith.minimumf %22, %21 : vector<8x1xf32>
    %24 = arith.mulf %23, %23 : vector<8x1xf32>
    %cst_13 = arith.constant 1.000000e+00 : f32
    %25 = vector.broadcast %cst_13 : f32 to vector<8x1xf32>
    %26 = arith.subf %25, %24 : vector<8x1xf32>
    %cst_14 = arith.constant 0.000000e+00 : f32
    %27 = vector.broadcast %cst_14 : f32 to vector<8x1xf32>
    %28 = arith.maximumf %26, %27 : vector<8x1xf32>
    %29 = math.sqrt %28 : vector<8x1xf32>
    %cst_15 = arith.constant 0.995004177 : f32
    %30 = vector.broadcast %cst_15 : f32 to vector<8x1xf32>
    %31 = arith.mulf %23, %30 : vector<8x1xf32>
    %cst_16 = arith.constant 0.0998334139 : f32
    %32 = vector.broadcast %cst_16 : f32 to vector<8x1xf32>
    %33 = arith.mulf %29, %32 : vector<8x1xf32>
    %34 = arith.subf %31, %33 : vector<8x1xf32>
    %cst_17 = arith.constant -0.995004177 : f32
    %35 = vector.broadcast %cst_17 : f32 to vector<8x1xf32>
    %36 = arith.cmpf oge, %23, %35 : vector<8x1xf32>
    %37 = arith.select %36, %34, %19 : vector<8x1xi1>, vector<8x1xf32>
    %38 = vector.shape_cast %37 : vector<8x1xf32> to vector<8x1xf32>
    %39 = vector.broadcast %38 : vector<8x1xf32> to vector<8x128xf32>
    %40 = arith.select %15, %39, %8 : vector<8x128xi1>, vector<8x128xf32>
    %c0_18 = arith.constant 0 : index
    %41 = memref.load %arg7[%c0_18] : memref<1xf32, #tpu.memory_space<smem>>
    %42 = vector.broadcast %41 : f32 to vector<8x128xf32>
    %43 = arith.mulf %42, %40 : vector<8x128xf32>
    %c0_19 = arith.constant 0 : index
    %c0_20 = arith.constant 0 : index
    %44 = vector.load %arg8[%c0_19, %c0_20] : memref<8x128xf32, #tpu.memory_space<vmem>>, vector<8x128xf32>
    tpu.vector_store %arg8[%c0_19, %c0_20], %43 {strides = array<i32>} : memref<8x128xf32, #tpu.memory_space<vmem>>, vector<8x128xf32>,
    return
  }
  func.func @transform_0(%arg0: i32, %arg1: i32) -> (i32, i32) {
    %c0_i32 = arith.constant 0 : i32
    %c0_i32_0 = arith.constant 0 : i32
    return %arg0, %c0_i32 : i32, i32
  }
  func.func @transform_1(%arg0: i32, %arg1: i32) -> (i32, i32) {
    %c0_i32 = arith.constant 0 : i32
    %c0_i32_0 = arith.constant 0 : i32
    return %arg0, %c0_i32 : i32, i32
  }
  func.func @transform_2(%arg0: i32, %arg1: i32) -> (i32, i32) {
    %c0_i32 = arith.constant 0 : i32
    %c0_i32_0 = arith.constant 0 : i32
    return %c0_i32, %arg1 : i32, i32
  }
  func.func @transform_3(%arg0: i32, %arg1: i32) -> (i32, i32) {
    %c0_i32 = arith.constant 0 : i32
    %c0_i32_0 = arith.constant 0 : i32
    return %c0_i32, %arg1 : i32, i32
  }
  func.func @transform_4(%arg0: i32, %arg1: i32) -> (i32, i32) {
    %c0_i32 = arith.constant 0 : i32
    %c0_i32_0 = arith.constant 0 : i32
    return %arg0, %c0_i32 : i32, i32
  }
  func.func @transform_5(%arg0: i32, %arg1: i32) -> i32 {
    %c0_i32 = arith.constant 0 : i32
    %c0_i32_0 = arith.constant 0 : i32
    return %c0_i32 : i32
  }
  func.func @transform_6(%arg0: i32, %arg1: i32) -> (i32, i32) {
    %c0_i32 = arith.constant 0 : i32
    return %arg0, %arg1 : i32, i32
  }
}

</mosaic_0001>

<bundles_post_ra>
// kernel: tpu_custom_call.1
= control target key start
LH: loop header
LB: loop body
LE: loop exit
PB: predicated region body
PF: predicated region fallthrough
CT: control target
= control target key end

     0   :  { %s1217_s0 = inlined_call_operand.vmem [shape: f32[16,32], index: 0, kind: input, shape index: {}]   ;;  %s1218_s1 = inlined_call_operand.vmem [shape: f32[16,1], index: 1, kind: input, shape index: {}]   ;;  %s1219_s2 = inlined_call_operand.hbm [shape: f32[32,384], index: 2, kind: input, shape index: {}]   ;;  %s1220_s3 = inlined_call_operand.vmem [shape: f32[1,384], index: 3, kind: input, shape index: {}]   ;;  %s1221_s4 = inlined_call_operand.vmem [shape: s32[16,1], index: 4, kind: input, shape index: {}]   ;;  %s1222_s5 = inlined_call_operand.<no memory space> [shape: f32[1], index: 5, kind: input, shape index: {}]   ;;  %s1223_s6 = inlined_call_operand.hbm [shape: f32[16,384], index: 6, kind: output, shape index: {}]  }
   0x1   :  { %1228 = sst [smem:[#allocation12_spill]] %s1219_s2 }
   0x2   :  { %11 = sst [smem:[#allocation2]] %s1222_s5 }
   0x3   :  { %12 = vsyncpa [#allocation4], 0 }
   0x4   :  { %14 = vsyncpa [#allocation4 + $0x1], 0 }
   0x5   :  { %15 = vsyncpa [#allocation5], 0 }
   0x6   :  { %17 = vsyncpa [#allocation5 + $0x1], 0  ;;  %s981_s23 = smov 0   ;;  %s983_s24 = smov 0  }
   0x7   :  { %s985_s25 = smov 0   ;;  %s987_s26 = smov 0  }
   0x8   :  { %s989_s27 = smov 0   ;;  %s991_s28 = smov 0  }
   0x9   :  { %s993_s29 = smov 0   ;;  %s995_s30 = smov 0  }
   0xa   :  { %s997_s5 = smov 0   ;;  %s999_s7 = smov 0  }
   0xb   :  { %s1001_s8 = smov 0  }
   0xc LB: > { %1229 = sst [smem:[#allocation9_spill]] %s928_s7  ;;  %s625_s9 = sadd.s32 4294967295, %s932_s8   ;;  %s932_s8 = sphi %s1001_s8, %s23_s8   ;;  %s928_s7 = sphi %s999_s7, %s1242_s7   ;;  %s924_s5 = sphi %s997_s5, %s1250_s5   ;;  %s920_s30 = sphi %s995_s30, %s1240_s30   ;;  %s916_s29 = sphi %s993_s29, %s1249_s29   ;;  %s912_s28 = sphi %s991_s28, %s1248_s28   ;;  %s908_s27 = sphi %s989_s27, %s1247_s27   ;;  %s904_s26 = sphi %s987_s26, %s1246_s26   ;;  %s900_s25 = sphi %s985_s25, %s1245_s25   ;;  %s896_s24 = sphi %s983_s24, %s1244_s24   ;;  %s892_s23 = sphi %s981_s23, %s1243_s23  }
   0xd   : > { %s626_s10 = sadd.s32 4294967294, %s932_s8   ;;  %s32_s11 = sadd.s32 1, %s924_s5 }
   0xe   : > { %s35_s12 = sadd.s32 1, %s928_s7  ;;  %p33_p0 = scmp.ge.s32.totalorder %s32_s11, 3 }
   0xf   : > { %s94_s13 = sadd.s32 1, %s912_s28  ;;  %p101_p1 = scmp.ne.s32.totalorder %s912_s28, %s908_s27 }
  0x10   : > { %p102_p2 = scmp.eq.s32.totalorder %s932_s8, 0  ;;  %s1252_s11 = smov (%p33_p0, %s32_s11), 0 }
  0x11   : > { %1230 = sst [smem:[#allocation10_spill]] %s1252_s11  ;;  %s1254_s12 = smov (!%p33_p0, %s35_s12), %s928_s7 }
  0x12   : > { %s91_s14 = ssub.s32 %s924_s5, %s1252_s11  ;;  %p1047_p3 = por %p102_p2, %p101_p1 }
  0x13   : > { %p37_p4 = scmp.ge.s32.totalorder %s1254_s12, 2  ;;  %p92_p5 = scmp.eq.s32.totalorder %s91_s14, 0 }
  0x14   : > { %p107_p6 = scmp.ne.s32.totalorder %s908_s27, %s904_s26  ;;  %p108_p7 = scmp.eq.s32.totalorder %s625_s9, 0 }
  0x15   : > { %s1256_s12 = smov (%p37_p4, %s1254_s12), 0  ;;  %s195_s20 = sadd.s32 1, %s900_s25 }
  0x16   : > { %1232 = sst [smem:[#allocation11_spill]] %s1256_s12  ;;  %p1057_p8 = por %p108_p7, %p107_p6 }
  0x17   : > { %s1055_s16 = scalar_select %p92_p5, %s912_s28, %s94_s13  }
  0x18   : > { %s190_s18 = ssub.s32 %s928_s7, %s1256_s12  ;;  %p205_p10 = scmp.ne.s32.totalorder %s900_s25, %s896_s24 }
  0x19   : > { %s192_s19 = sor.u32 %s190_s18, %s91_s14  ;;  %p206_p11 = scmp.eq.s32.totalorder %s625_s9, 5 }
  0x1a   : > { %p193_p9 = scmp.eq.s32.totalorder %s192_s19, 0  ;;  %p211_p12 = scmp.ne.s32.totalorder %s896_s24, %s892_s23 }
  0x1b   : > { %p1071_p13 = por %p206_p11, %p205_p10  ;;  %p212_p0 = scmp.eq.s32.totalorder %s626_s10, 5 }
  0x1c   : > { %s1069_s21 = scalar_select %p193_p9, %s900_s25, %s195_s20  }
  0x1d   : > { %s1234_s22 = scalar_select %p1071_p13, 1, 0 }
  0x1e   : > { %p680_p1 = scmp.lt.s32.totalorder %s932_s8, 6  ;;  %p1076_p2 = por %p212_p0, %p211_p12 }
  0x1f   : > { %s249_s13 = sand.u32 1, %s912_s28   ;;  %s630_s18 = sshll.u32 %s924_s5, 7 }
  0x20   : > { %s1235_s26 = scalar_select %p1076_p2, 1, 0 }
  0x21   : > { %s629_s14 = sshll.u32 %s249_s13, 5  ;;  %s1236_s2 = sld [smem:[#allocation12_spill]] }
  0x22   : > { %s253_s20 = scalar_lea.vmem [#allocation3], %s629_s14  ;;  %p1091_p4 = pnand %p680_p1, %p1047_p3 }
  0x23   : > { %s259_s11 = sshll.u32 %s253_s20, 4  ;;  %s1095_s7 = scalar_lea.sflag [#allocation4], %s249_s13  ;;  %s1087_s11 = int_to_ptr.vmem [resolvable:$true] %s259_s11 }
  0x24   : > { %p782_p6 = pneg %p1091_p4 }
  0x27   : > { %s1085_s9 = scalar_lea.hbm %s1236_s2, %s630_s18  ;;  %s785_s15 = scalar_lea.hbm %s1236_s2, 1536 }
  0x28   : > { %s780_s12 = scalar_lea.hbm %s1085_s9, 512  ;;  %p786_p3 = scmp.lt.u32.totalorder %s1085_s9, %s1236_s2 }
  0x29   : > { %p781_p5 = scmp.ne.s32.totalorder %s1085_s9, %s780_s12  ;;  %p787_p10 = scmp.lt.u32.totalorder %s785_s15, %s780_s12 }
  0x2a   : > { %p789_p12 = scmp.lt.u32.totalorder %s780_s12, %s1085_s9 }
  0x2b   : > { %p783_p7 = pnand %p782_p6, %p781_p5  ;;  %p788_p11 = por %p787_p10, %p786_p3 }
  0x2d   : > { %p784_p9 = pneg %p783_p7  ;;  %p790_p0 = por %p789_p12, %p788_p11 }
  0x2f   : > { %p791_p1 = pnand %p790_p0, %p784_p9 }
  0x31   : > { %794 = shalt.err (!%p791_p1)
}
  0x32   : > { %s795_s13 = scalar_lea.vmem %s1087_s11, 512  ;;  %s934_s14 = smov [#allocation3]  }
  0x33   : > { %p796_p5 = scmp.ne.s32.totalorder %s1087_s11, %s795_s13  ;;  %s800_s18 = sshll.u32 %s934_s14, 4  ;;  %s801_s18 = int_to_ptr.vmem [resolvable:$false] %s800_s18 }
  0x34   : > { %s802_s19 = scalar_lea.vmem %s801_s18, 1024  ;;  %p803_p13 = scmp.lt.s32.totalorder %s1087_s11, %s801_s18 }
  0x35   : > { %p798_p7 = pnand %p796_p5, %p782_p6  ;;  %p804_p3 = scmp.lt.s32.totalorder %s802_s19, %s795_s13 }
  0x37   : > { %p799_p2 = pneg %p798_p7  ;;  %p805_p10 = por %p804_p3, %p803_p13 }
  0x39   : > { %p806_p11 = pnand %p805_p10, %p799_p2 }
  0x3b   : > { %809 = shalt.err (!%p806_p11)
}
  0x3c   : > { %s935_s12 = smov 384   ;;  %s936_s15 = smov 128  }
  0x3d   : > { %s937_s20 = smov 8   ;;  %p631_p6 = scmp.ge.s32.totalorder %s932_s8, 1 }
  0x3e   : > { %675 = dma.hbm_to_vmem [thread:$0]  (!%p1091_p4), %s1085_s9, 512, %s1087_s11, %s1095_s7, %s935_s12, %s936_s15, %s937_s20  }
  0x3f   : > { %p280_p9 = scmp.lt.s32.totalorder %s932_s8, 7 }
  0x41   : > { %p281_p12 = pnand %p631_p6, %p280_p9 }
  0x42   : > { %s286_s13 = sand.u32 (!%p281_p12), 1, %s908_s27  }
  0x43   : > { %284 = sbr.rel (%p281_p12) target bundleno = 612 (0x264), region = 44  ;;  %s632_s14 = sshll.u32 (!%p281_p12), %s286_s13, 5 }
  0x44   : > { %s287_s18 = scalar_lea.sflag (!%p281_p12), [#allocation4], %s286_s13  ;;  %s290_s19 = scalar_lea.vmem (!%p281_p12), [#allocation3], %s632_s14 }
  0x4a   : > { %883 = dma.done.wait (%p1057_p8), %s287_s18, 512  }
  0x4b   : > { %885 = vsyncadd (%p1057_p8), %s287_s18, 4294966784  ;;  %p334_p13 = scmp.lt.s32.totalorder %s920_s30, 1  ;;  %p342_p2 = scmp.lt.s32.totalorder %s916_s29, 2  ;;  %v938_v0 = vmov 0   ;;  %v939_v1 = vmov 0.0|0.0   ;;  %v357_v3 = vld [vmem:[%s290_s19] sm:$0xff]  ;;  %v448_v19 = vlaneseq }
  0x4c   : > { %777 = vset.pattern.permute.xlu0 %v938_v0  ;;  %661 = vmatprep.subr.bf16.mxu0 %v939_v1  ;;  %v358_v4 = vld [vmem:[%s290_s19 + $0x8] sm:$0xff]  ;;  %v359_v6 = vld [vmem:[%s290_s19 + $0x10] sm:$0xff]  ;;  %v360_v10 = vld [vmem:[%s290_s19 + $0x18] sm:$0xff]  ;;  %vm940_vm0 = vmmov 0   ;;  %v941_v12 = vmov 0.0   ;;  %vm372_vm1 = vcmask 261120  }
  0x4d   : > { %s335_s7 = scalar_select %p334_p13, %s920_s30, 1  ;;  %658 = vmatprep.mubr.msk.f32.mxu0 %vm940_vm0, %v941_v12  ;;  %v449_v20 = vand.u32 127, %v448_v19 }
  0x4e   : > { %s343_s11 = scalar_select %p342_p2, %s916_s29, 2 }
  0x4f   : > { %s634_s9 = sshll.u32 %s335_s7, 3  ;;  %s639_s19 = sshll.u32 %s916_s29, 7 }
  0x50   : > { %s341_s15 = scalar_lea.vmem %s1218_s1, %s634_s9  ;;  %s348_s13 = scalar_lea.vmem %s1221_s4, %s634_s9  ;;  %v450_v21 = vstv %s639_s19 }
  0x51   : > { %s344_s2 = scalar_lea.vmem %s1220_s3, %s343_s11  ;;  %v350_v2 = vld [vmem:[%s341_s15] sm:$0xff]  ;;  %v451_v22 = vadd.s32 %v450_v21, %v449_v20  ;;  %s477_s10 = sld [smem:[#allocation2]] }
  0x52   : > { %353 = vperm.xlu0 %777, %v350_v2   ;;  %v637_v5 = vld [vmem:[%s344_s2] ss:$0 sm:$0xff]  ;;  %s337_s2 = scalar_lea.vmem %s1217_s0, %s634_s9  ;;  %s331_s9 = sand.u32 1, %s896_s24  }
  0x53   : > { %v446_v7 = vld [vmem:[%s348_s13] sm:$0xff]  ;;  %v368_v8 = vmul.f32 %v637_v5, %v357_v3  ;;  %v369_v9 = vmul.f32 %v637_v5, %v358_v4  ;;  %v370_v11 = vmul.f32 %v637_v5, %v359_v6  ;;  %v371_v13 = vmul.f32 %v637_v5, %v360_v10  ;;  %s667_s12 = smul.u32 3, %s920_s30  ;;  %s633_s15 = sshll.u32 %s331_s9, 3 }
  0x54   : > { %v349_v16 = vld [vmem:[%s337_s2] sm:$0xff]  ;;  %s333_s13 = scalar_lea.vmem [#allocation6], %s633_s15  ;;  %p1238_p4 = scmp.ne.s32.totalorder %s1234_s22, 0 }
  0x55   : > { %v662_v14 = vpack.c.bf16 %v369_v9, %v368_v8  ;;  %v665_v15 = vpack.c.bf16 %v371_v13, %v370_v11  ;;  %s493_s20 = sadd.s32 %s916_s29, %s667_s12  ;;  %s497_s14 = sshll.u32 %s333_s13, 4  ;;  %s1157_s14 = int_to_ptr.vmem [resolvable:$true] %s497_s14 }
  0x56   : > { %453 = vperm.xlu0 %777, %v446_v7   ;;  %s642_s17 = sshll.u32 %s493_s20, 7  ;;  %s482_s29 = scalar_lea.sflag [#allocation5], %s331_s9 }
  0x57   : > { %663 = vmatpush3.bf16.msra.mxu0 %v662_v14  ;;  %v478_v40 = vstv %s477_s10  ;;  %s1155_s7 = scalar_lea.hbm %s1223_s6, %s642_s17  ;;  %s810_s11 = scalar_lea.vmem %s1157_s14, 128 }
  0x58   : > { %664 = vmatprep.subr.bf16.mxu0 %v939_v1  ;;  %p811_p8 = scmp.ne.s32.totalorder %s1157_s14, %s810_s11  ;;  %s942_s2 = smov [#allocation6]  }
  0x59   : > { %s814_s19 = sshll.u32 %s942_s2, 4  ;;  %s815_s19 = int_to_ptr.vmem [resolvable:$false] %s814_s19 }
  0x5a   : > { %p812_p0 = pnand %p811_p8, %p1238_p4  ;;  %s816_s10 = scalar_lea.vmem %s815_s19, 256 }
  0x5b   : > { %666 = vmatpush3.bf16.msra.mxu0 %v665_v15  ;;  %p817_p5 = scmp.lt.s32.totalorder %s1157_s14, %s815_s19  ;;  %p818_p7 = scmp.lt.s32.totalorder %s816_s10, %s810_s11 }
  0x5c   : > { %p813_p1 = pneg %p812_p0 }
  0x5d   : > { %p819_p3 = por %p818_p7, %p817_p5 }
  0x5f   : > { %p820_p10 = pnand %p819_p3, %p813_p1 }
  0xd1   : > { %v354_v17 = vpop.permute.xlu0 %353 }
  0xd2   : > { %v356_v18 = vmul.f32 %v354_v17, %v349_v16 }
  0xd4   : > { %659 = vmatmul.mubr.msk.f32.vlgmr.msra.gmra.mrb[0].mxu0 %vm372_vm1, %v356_v18 }
  0xd5   : > { %v454_v23 = vpop.permute.xlu0 %453 }
  0xd6   : > { %vm455_vm2 = vcmp.eq.s32.totalorder %v454_v23, %v451_v22 }
 0x1a7   : > { %v442_v24 = vpop.f32.mrb[0].mxu0 }
 0x1a8   : > { %v660_v25 = vpop.f32.mrb[1].mxu0  ;;  %v456_v26 = vsel %vm455_vm2, %v442_v24, 0.0 }
 0x1a9   : > { %457 = vadd.xlane.f32.xlu1 %v456_v26 }
 0x236   : > { %v458_v27 = vpop.xlane.xlu1 %457 }
 0x237   : > { %v640_v28 = vclamps-f32 %v458_v27, 1.0 }
 0x239   : > { %v461_v29 = vmul.f32 %v640_v28, %v640_v28  ;;  %v471_v37 = vmul.f32 0.9950042, %v640_v28  ;;  %vm474_vm5 = vcmp.ge.f32.partialorder %v640_v28, -0.9950042 }
 0x23b   : > { %v462_v30 = vsub.f32 1.0, %v461_v29 }
 0x23d   : > { %v463_v31 = vmax.f32 %v462_v30, 0.0 }
 0x23f   : > { %778 = vrsqrt.f32 %v463_v31  ;;  %vm466_vm3 = vcmp.eq.f32.partialorder %v463_v31, inf  ;;  %v469_v34 = vand.u32 2147483648, %v463_v31  ;;  %vm468_vm4 = vcmp.eq.f32.partialorder %v463_v31, 0.0 }
 0x249   : > { %v779_v32 = vpop.eup %778 }
 0x24a   : > { %v465_v33 = vmul.f32 %v779_v32, %v463_v31 }
 0x24c   : > { %v467_v35 = vsel %vm466_vm3, %v463_v31, %v465_v33 }
 0x24d   : > { %v470_v36 = vsel %vm468_vm4, %v469_v34, %v467_v35 }
 0x24e   : > { %v472_v38 = vmul.f32 0.099833414, %v470_v36 }
 0x250   : > { %v473_v39 = vsub.f32 %v471_v37, %v472_v38 }
 0x252   : > { %v475_v41 = vsel %vm474_vm5, %v473_v39, %v458_v27 }
 0x253   : > { %v476_v42 = vsel %vm455_vm2, %v475_v41, %v442_v24 }
 0x254   : > { %v479_v43 = vmul.f32 %v478_v40, %v476_v42 }
 0x256   : > { %480 = vst [vmem:[%s333_s13] sm:$0xff] %v479_v43 }
 0x257   : > { %823 = shalt.err (!%p820_p10)
}
 0x258   : > { %s824_s9 = scalar_lea.hbm %s1155_s7, 128  ;;  %s828_s20 = scalar_lea.hbm %s1223_s6, 768 }
 0x259   : > { %p825_p11 = scmp.ne.s32.totalorder %s1155_s7, %s824_s9  ;;  %p829_p12 = scmp.lt.u32.totalorder %s1155_s7, %s1223_s6 }
 0x25a   : > { %p830_p13 = scmp.lt.u32.totalorder %s828_s20, %s824_s9  ;;  %p832_p8 = scmp.lt.u32.totalorder %s824_s9, %s1155_s7 }
 0x25b   : > { %p826_p6 = pnand %p825_p11, %p1238_p4 }
 0x25c   : > { %p831_p2 = por %p830_p13, %p829_p12 }
 0x25d   : > { %p827_p9 = pneg %p826_p6 }
 0x25e   : > { %p833_p0 = por %p832_p8, %p831_p2 }
 0x260   : > { %p834_p1 = pnand %p833_p0, %p827_p9 }
 0x262   : > { %837 = shalt.err (!%p834_p1)
}
 0x263   : > { %670 = dma.vmem_to_hbm [thread:$0]  (%p1238_p4), %s1157_s14, 128, %s1155_s7, %s482_s29  }
 0x264 PF: > { %p681_p5 = scmp.ge.s32.totalorder %s932_s8, 2  ;;  %s509_s30 = sand.u32 1, %s892_s23  }
 0x265   : > { %p1239_p7 = scmp.ne.s32.totalorder %s1235_s26, 0  ;;  %s510_s18 = scalar_lea.sflag [#allocation5], %s509_s30 }
 0x267   : > { %p677_p3 = pnand %p681_p5, %p1239_p7 }
 0x269   : > { %887 = dma.done.wait (!%p677_p3), %s510_s18, 128  }
 0x26a   : > { %889 = vsyncadd (!%p677_p3), %s510_s18, 4294967168  ;;  %s23_s8 = sadd.s32 1, %s932_s8   ;;  %s1240_s30 = sld [smem:[#allocation9_spill]] }
 0x26b   : > { %p20_p10 = scmp.ge.s32.totalorder %s23_s8, 8   ;;  %s1241_s22 = sld [smem:[#allocation10_spill]] }
 0x26c   : > { %s1242_s7 = sld [smem:[#allocation11_spill]]  ;;  %s1243_s23 = smov %s896_s24 }
 0x26d   : > { %s1244_s24 = smov %s900_s25  ;;  %s1245_s25 = smov %s1069_s21 }
 0x26e   : > { %s1246_s26 = smov %s908_s27  ;;  %s1247_s27 = smov %s912_s28 }
 0x26f   : > { %s1248_s28 = smov %s1055_s16  ;;  %s1249_s29 = smov %s924_s5 }
 0x270   :  { %22 = sbr.rel (!%p20_p10) target bundleno = 12 (0xc), region = 101 }
 0x271   : > { %s1250_s5 = smov %s1241_s22 }
 0x277   :  { %515 = vsyncpa [#allocation4], 1 }
 0x278   :  { %517 = vsyncpa [#allocation4 + $0x1], 1 }
 0x279   :  { %518 = vsyncpa [#allocation5], 1 }
 0x27a   :  { %520 = vsyncpa [#allocation5 + $0x1], 1 }

</bundles_post_ra>
